<compile_context>
chip_gen: v7x
topology: tpu7x:2x2x1
jax: 0.10.0
libtpu: 0.0.40
codegen_flags: <defaults>
</compile_context>

<pallas_src>
import functools

import jax
import jax.numpy as jnp
from jax import lax
from jax.experimental import pallas as pl
from jax.experimental.pallas import tpu as pltpu


_CHUNK = 512                    # lanes per in-kernel sub-chunk (multiple of 128)
_BLOCK_QUANTUM = 8 * _CHUNK     # 4096: keeps the output tile's sublane count % 8 == 0


def _round_up(x, m):
    return ((x + m - 1) // m) * m


def _cdiv(a, b):
    return (a + b - 1) // b


def _ffnet_kernel(x_ref,
                  w1_ref, b1_ref,
                  w2_ref, b2_ref,
                  w3_ref, b3_ref,
                  w4c_ref, b4_ref,
                  o_ref, *, chunk, num_chunks):
    """One batch block.

    x_ref  : (block, F)            natural (N, F) layout, F on lanes
    w1..w3 : (out_i, in_i)         compute_dtype (PyTorch nn.Linear layout)
    w4c    : (6, 1) float32        layer-4 weight as a column (VPU epilogue)
    b_i    : (out_i, 1) float32    f32 bias -> f32 accumulation
    o_ref  : (num_chunks, chunk)   lane-dense f32 output rows, one per chunk
    """
    cdt = w1_ref.dtype
    w1 = w1_ref[...]
    w2 = w2_ref[...]
    w3 = w3_ref[...]
    w4c = w4c_ref[...]          # stays f32 on purpose
    b1 = b1_ref[...]
    b2 = b2_ref[...]
    b3 = b3_ref[...]
    b4 = b4_ref[...]

    def compute(c, carry):
        start = pl.multiple_of(c * chunk, chunk)
        xc = x_ref[pl.ds(start, chunk), :].astype(cdt)          # (chunk, F)

        # Layer 1: W1 @ xc^T -> (36, chunk).  Contraction on both dim-1
        # (the standard q@k^T pattern); batch lives on the MXU N / lane axis.
        h = lax.dot_general(w1, xc, (((1,), (1,)), ((), ())),
                            preferred_element_type=jnp.float32) + b1
        h = jnp.maximum(h, 0.0)

        h = jnp.dot(w2, h.astype(cdt),
                    preferred_element_type=jnp.float32) + b2    # (12, chunk)
        h = jnp.maximum(h, 0.0)

        h = jnp.dot(w3, h.astype(cdt),
                    preferred_element_type=jnp.float32) + b3    # (6, chunk)
        h = jnp.maximum(h, 0.0)

        # Layer 4 (1x6): broadcast-multiply + sublane reduce (VPU/XLU), f32.
        out = jnp.sum(w4c * h, axis=0, keepdims=True) + b4      # (1, chunk)

        o_ref[pl.ds(c, 1), :] = out.astype(o_ref.dtype)
        return carry

    lax.fori_loop(0, num_chunks, compute, 0, unroll=min(4, num_chunks))


@functools.partial(jax.jit, static_argnames=("block_n", "compute_dtype"))
def ffnet_forward(x, params, block_n=8192, compute_dtype=jnp.bfloat16):
    """x: (N, F) float32 (or bfloat16).  params: w_i (out, in), b_i (out, 1).

    Returns (N, 1) float32.  compute_dtype controls the matmul operand dtype
    only; accumulation, biases, ReLU and layer 4 stay f32.  Use
    compute_dtype=jnp.float32 to match the f32 reference to ~1e-5.
    """
    n, f = x.shape

    if n < _BLOCK_QUANTUM:
        # Small batch: one exact block == the full array (no padding, no
        # ragged tiles, no sublane-alignment constraints to satisfy).
        block = chunk = max(n, 1)
        num_chunks = 1
        num_blocks = 1
    else:
        chunk = _CHUNK
        # Block is a multiple of 4096 (so the output tile has a sublane count
        # divisible by 8) and never exceeds N (only the last tile is ragged).
        block = min(_round_up(max(block_n, _BLOCK_QUANTUM), _BLOCK_QUANTUM),
                    (n // _BLOCK_QUANTUM) * _BLOCK_QUANTUM)
        num_blocks = _cdiv(n, block)
        # v7x has 2 TensorCores: prefer >= 2 grid tiles when N is big enough.
        if num_blocks < 2 and n >= 2 * _BLOCK_QUANTUM:
            block = _round_up(_cdiv(n, 2), _BLOCK_QUANTUM)
            num_blocks = _cdiv(n, block)
        num_chunks = block // chunk

    # Matmul weights in compute_dtype; layer-4 weight and all biases stay f32
    # (f32 accumulation / epilogue — do not cast these).
    w1 = params["w1"].astype(compute_dtype)
    w2 = params["w2"].astype(compute_dtype)
    w3 = params["w3"].astype(compute_dtype)
    w4c = params["w4"].reshape(-1, 1).astype(jnp.float32)   # (6, 1)
    b1 = params["b1"].astype(jnp.float32)
    b2 = params["b2"].astype(jnp.float32)
    b3 = params["b3"].astype(jnp.float32)
    b4 = params["b4"].astype(jnp.float32)

    def _full(arr):
        nd = arr.ndim
        return pl.BlockSpec(arr.shape, lambda i, _nd=nd: (0,) * _nd)

    kernel = functools.partial(_ffnet_kernel, chunk=chunk, num_chunks=num_chunks)

    # The (block, F) x tile is lane-padded to 128 inside VMEM; budget for the
    # double-buffered pair plus headroom (default block=8192 -> ~10 MiB).
    lane_f = _round_up(f, 128)
    vmem_est = 2 * block * lane_f * x.dtype.itemsize + (2 << 20)
    vmem_limit = int(min(max(vmem_est, 32 << 20), 48 << 20))

    out = pl.pallas_call(
        kernel,
        out_shape=jax.ShapeDtypeStruct((num_blocks * num_chunks, chunk),
                                       jnp.float32),
        grid_spec=pl.GridSpec(
            grid=(num_blocks,),
            in_specs=[
                pl.BlockSpec((block, f), lambda i: (i, 0)),   # x, natural layout
                _full(w1), _full(b1),
                _full(w2), _full(b2),
                _full(w3), _full(b3),
                _full(w4c), _full(b4),
            ],
            out_specs=pl.BlockSpec((num_chunks, chunk), lambda i: (i, 0)),
        ),
        compiler_params=pltpu.CompilerParams(
            dimension_semantics=("parallel",),
            vmem_limit_bytes=vmem_limit),
    )(x, w1, b1, w2, b2, w3, b3, w4c, b4)

    # Row-major flatten recovers batch order; rows >= n (ragged-tile garbage)
    # are dropped here.
    return out.reshape(-1, 1)[:n]


def init_ffnet_params(key, num_features):
    """nn.Linear-style U(-1/sqrt(fan_in), 1/sqrt(fan_in)) init.

    Weights stored in PyTorch layout (out, in); biases as (out, 1).
    """
    dims = [num_features, 36, 12, 6, 1]
    params = {}
    for layer in range(4):
        fan_in, fan_out = dims[layer], dims[layer + 1]
        key, kw, kb = jax.random.split(key, 3)
        bound = 1.0 / jnp.sqrt(jnp.float32(fan_in))
        params[f"w{layer + 1}"] = jax.random.uniform(
            kw, (fan_out, fan_in), jnp.float32, minval=-bound, maxval=bound)
        params[f"b{layer + 1}"] = jax.random.uniform(
            kb, (fan_out, 1), jnp.float32, minval=-bound, maxval=bound)
    return params


def ffnet_reference(x, params):
    """Pure-JAX reference matching the PyTorch forward."""
    h = jnp.maximum(x @ params["w1"].T + params["b1"].T, 0.0)
    h = jnp.maximum(h @ params["w2"].T + params["b2"].T, 0.0)
    h = jnp.maximum(h @ params["w3"].T + params["b3"].T, 0.0)
    return h @ params["w4"].T + params["b4"].T


if __name__ == "__main__":
    key = jax.random.PRNGKey(0)
    key, kx, kp, kx2 = jax.random.split(key, 4)

    num_features = 16  # "p" in the PyTorch module
    params = init_ffnet_params(kp, num_features)

    # Small shape (batch=16, p=16): exercises the single exact-block path.
    x_small = jax.random.normal(kx, (16, num_features), dtype=jnp.float32)
    ref_small = ffnet_reference(x_small, params)

    out_f32 = jax.block_until_ready(
        ffnet_forward(x_small, params, compute_dtype=jnp.float32))
    assert out_f32.shape == (16, 1), out_f32.shape
    assert jnp.allclose(out_f32, ref_small, atol=1e-5, rtol=1e-5), (
        f"f32 max abs err {jnp.max(jnp.abs(out_f32 - ref_small))}")

    out_bf16 = jax.block_until_ready(ffnet_forward(x_small, params))
    assert out_bf16.shape == (16, 1), out_bf16.shape
    assert jnp.allclose(out_bf16, ref_small, atol=5e-2, rtol=5e-2), (
        f"bf16 max abs err {jnp.max(jnp.abs(out_bf16 - ref_small))}")

    # Medium shape: exercises the multi-block, chunked, ragged-last-tile path.
    x_med = jax.random.normal(kx2, (5000, num_features), dtype=jnp.float32)
    ref_med = ffnet_reference(x_med, params)
    out_med = jax.block_until_ready(
        ffnet_forward(x_med, params, compute_dtype=jnp.float32))
    assert out_med.shape == (5000, 1), out_med.shape
    assert jnp.allclose(out_med, ref_med, atol=1e-5, rtol=1e-5), (
        f"multi-block f32 max abs err {jnp.max(jnp.abs(out_med - ref_med))}")

    print("KERNEL_OK")
</pallas_src>

<mosaic_0001>
module attributes {stable_mosaic.version = 11 : i64} {
  func.func @_ffnet_kernel(%arg0: i32, %arg1: memref<16x16xf32, #tpu.memory_space<vmem>>, %arg2: memref<36x16xf32, #tpu.memory_space<vmem>>, %arg3: memref<36x1xf32, #tpu.memory_space<vmem>>, %arg4: memref<12x36xf32, #tpu.memory_space<vmem>>, %arg5: memref<12x1xf32, #tpu.memory_space<vmem>>, %arg6: memref<6x12xf32, #tpu.memory_space<vmem>>, %arg7: memref<6x1xf32, #tpu.memory_space<vmem>>, %arg8: memref<6x1xf32, #tpu.memory_space<vmem>>, %arg9: memref<1x1xf32, #tpu.memory_space<vmem>>, %arg10: memref<1x16xf32, #tpu.memory_space<vmem>>) attributes {dimension_semantics = [#tpu.dimension_semantics<parallel>], iteration_bounds = array<i64: 1>, scalar_prefetch = 0 : i64, scratch_operands = 0 : i64, tpu.core_type = #tpu.core_type<tc>, window_params = [{transform_indices = @transform_0, window_bounds = array<i64: 16, 16>}, {pipeline_mode = #tpu.pipeline_mode<synchronous>, transform_indices = @transform_1, window_bounds = array<i64: 36, 16>}, {pipeline_mode = #tpu.pipeline_mode<synchronous>, transform_indices = @transform_2, window_bounds = array<i64: 36, 1>}, {pipeline_mode = #tpu.pipeline_mode<synchronous>, transform_indices = @transform_3, window_bounds = array<i64: 12, 36>}, {pipeline_mode = #tpu.pipeline_mode<synchronous>, transform_indices = @transform_4, window_bounds = array<i64: 12, 1>}, {pipeline_mode = #tpu.pipeline_mode<synchronous>, transform_indices = @transform_5, window_bounds = array<i64: 6, 12>}, {pipeline_mode = #tpu.pipeline_mode<synchronous>, transform_indices = @transform_6, window_bounds = array<i64: 6, 1>}, {pipeline_mode = #tpu.pipeline_mode<synchronous>, transform_indices = @transform_7, window_bounds = array<i64: 6, 1>}, {pipeline_mode = #tpu.pipeline_mode<synchronous>, transform_indices = @transform_8, window_bounds = array<i64: 1, 1>}, {transform_indices = @transform_9, window_bounds = array<i64: 1, 16>}]} {
    %c0 = arith.constant 0 : index
    %c0_0 = arith.constant 0 : index
    %0 = vector.load %arg2[%c0, %c0_0] : memref<36x16xf32, #tpu.memory_space<vmem>>, vector<36x16xf32>
    %c0_1 = arith.constant 0 : index
    %c0_2 = arith.constant 0 : index
    %1 = vector.load %arg4[%c0_1, %c0_2] : memref<12x36xf32, #tpu.memory_space<vmem>>, vector<12x36xf32>
    %c0_3 = arith.constant 0 : index
    %c0_4 = arith.constant 0 : index
    %2 = vector.load %arg6[%c0_3, %c0_4] : memref<6x12xf32, #tpu.memory_space<vmem>>, vector<6x12xf32>
    %c0_5 = arith.constant 0 : index
    %c0_6 = arith.constant 0 : index
    %3 = vector.load %arg8[%c0_5, %c0_6] : memref<6x1xf32, #tpu.memory_space<vmem>>, vector<6x1xf32>
    %c0_7 = arith.constant 0 : index
    %c0_8 = arith.constant 0 : index
    %4 = vector.load %arg3[%c0_7, %c0_8] : memref<36x1xf32, #tpu.memory_space<vmem>>, vector<36x1xf32>
    %c0_9 = arith.constant 0 : index
    %c0_10 = arith.constant 0 : index
    %5 = vector.load %arg5[%c0_9, %c0_10] : memref<12x1xf32, #tpu.memory_space<vmem>>, vector<12x1xf32>
    %c0_11 = arith.constant 0 : index
    %c0_12 = arith.constant 0 : index
    %6 = vector.load %arg7[%c0_11, %c0_12] : memref<6x1xf32, #tpu.memory_space<vmem>>, vector<6x1xf32>
    %c0_13 = arith.constant 0 : index
    %c0_14 = arith.constant 0 : index
    %7 = vector.load %arg9[%c0_13, %c0_14] : memref<1x1xf32, #tpu.memory_space<vmem>>, vector<1x1xf32>
    %c0_i32 = arith.constant 0 : i32
    %c16_i32 = arith.constant 16 : i32
    %8 = arith.muli %c0_i32, %c16_i32 : i32
    %9 = tpu.assume_multiple %8, 16 : i32
    %10 = arith.index_cast %9 : i32 to index
    %c0_15 = arith.constant 0 : index
    %11 = vector.load %arg1[%10, %c0_15] : memref<16x16xf32, #tpu.memory_space<vmem>>, vector<16x16xf32>
    %cst = arith.constant dense<0.000000e+00> : vector<36x16xf32>
    %12 = tpu.matmul %0, %11, %cst {dimension_numbers = #tpu.dot_dimension_numbers<[1], [1], [0], [0], [0, 0, 1, 0], [], []>} : vector<36x16xf32>, vector<16x16xf32>, vector<36x16xf32> -> vector<36x16xf32>
    %13 = vector.broadcast %4 : vector<36x1xf32> to vector<36x16xf32>
    %14 = arith.addf %12, %13 : vector<36x16xf32>
    %cst_16 = arith.constant 0.000000e+00 : f32
    %15 = vector.broadcast %cst_16 : f32 to vector<36x16xf32>
    %16 = arith.maximumf %14, %15 : vector<36x16xf32>
    %cst_17 = arith.constant dense<0.000000e+00> : vector<12x16xf32>
    %17 = tpu.matmul %1, %16, %cst_17 {dimension_numbers = #tpu.dot_dimension_numbers<[1], [0], [0], [1], [0, 0, 1, 1], [], []>} : vector<12x36xf32>, vector<36x16xf32>, vector<12x16xf32> -> vector<12x16xf32>
    %18 = vector.broadcast %5 : vector<12x1xf32> to vector<12x16xf32>
    %19 = arith.addf %17, %18 : vector<12x16xf32>
    %cst_18 = arith.constant 0.000000e+00 : f32
    %20 = vector.broadcast %cst_18 : f32 to vector<12x16xf32>
    %21 = arith.maximumf %19, %20 : vector<12x16xf32>
    %cst_19 = arith.constant dense<0.000000e+00> : vector<6x16xf32>
    %22 = tpu.matmul %2, %21, %cst_19 {dimension_numbers = #tpu.dot_dimension_numbers<[1], [0], [0], [1], [0, 0, 1, 1], [], []>} : vector<6x12xf32>, vector<12x16xf32>, vector<6x16xf32> -> vector<6x16xf32>
    %23 = vector.broadcast %6 : vector<6x1xf32> to vector<6x16xf32>
    %24 = arith.addf %22, %23 : vector<6x16xf32>
    %cst_20 = arith.constant 0.000000e+00 : f32
    %25 = vector.broadcast %cst_20 : f32 to vector<6x16xf32>
    %26 = arith.maximumf %24, %25 : vector<6x16xf32>
    %27 = vector.broadcast %3 : vector<6x1xf32> to vector<6x16xf32>
    %28 = arith.mulf %27, %26 : vector<6x16xf32>
    %cst_21 = arith.constant dense<0.000000e+00> : vector<16xf32>
    %29 = vector.multi_reduction <add>, %28, %cst_21 [0] : vector<6x16xf32> to vector<16xf32>
    %30 = vector.shape_cast %29 : vector<16xf32> to vector<1x16xf32>
    %31 = vector.broadcast %7 : vector<1x1xf32> to vector<1x16xf32>
    %32 = arith.addf %30, %31 : vector<1x16xf32>
    %33 = arith.index_cast %c0_i32 : i32 to index
    %c0_22 = arith.constant 0 : index
    %34 = vector.load %arg10[%33, %c0_22] : memref<1x16xf32, #tpu.memory_space<vmem>>, vector<1x16xf32>
    tpu.vector_store %arg10[%33, %c0_22], %32 {strides = array<i32>} : memref<1x16xf32, #tpu.memory_space<vmem>>, vector<1x16xf32>,
    %c1_i32 = arith.constant 1 : i32
    return
  }
  func.func @transform_0(%arg0: i32) -> (i32, i32) {
    %c0_i32 = arith.constant 0 : i32
    %c0_i32_0 = arith.constant 0 : i32
    return %arg0, %c0_i32 : i32, i32
  }
  func.func @transform_1(%arg0: i32) -> (i32, i32) {
    %c0_i32 = arith.constant 0 : i32
    %c0_i32_0 = arith.constant 0 : i32
    %c0_i32_1 = arith.constant 0 : i32
    return %c0_i32, %c0_i32_0 : i32, i32
  }
  func.func @transform_2(%arg0: i32) -> (i32, i32) {
    %c0_i32 = arith.constant 0 : i32
    %c0_i32_0 = arith.constant 0 : i32
    %c0_i32_1 = arith.constant 0 : i32
    return %c0_i32, %c0_i32_0 : i32, i32
  }
  func.func @transform_3(%arg0: i32) -> (i32, i32) {
    %c0_i32 = arith.constant 0 : i32
    %c0_i32_0 = arith.constant 0 : i32
    %c0_i32_1 = arith.constant 0 : i32
    return %c0_i32, %c0_i32_0 : i32, i32
  }
  func.func @transform_4(%arg0: i32) -> (i32, i32) {
    %c0_i32 = arith.constant 0 : i32
    %c0_i32_0 = arith.constant 0 : i32
    %c0_i32_1 = arith.constant 0 : i32
    return %c0_i32, %c0_i32_0 : i32, i32
  }
  func.func @transform_5(%arg0: i32) -> (i32, i32) {
    %c0_i32 = arith.constant 0 : i32
    %c0_i32_0 = arith.constant 0 : i32
    %c0_i32_1 = arith.constant 0 : i32
    return %c0_i32, %c0_i32_0 : i32, i32
  }
  func.func @transform_6(%arg0: i32) -> (i32, i32) {
    %c0_i32 = arith.constant 0 : i32
    %c0_i32_0 = arith.constant 0 : i32
    %c0_i32_1 = arith.constant 0 : i32
    return %c0_i32, %c0_i32_0 : i32, i32
  }
  func.func @transform_7(%arg0: i32) -> (i32, i32) {
    %c0_i32 = arith.constant 0 : i32
    %c0_i32_0 = arith.constant 0 : i32
    %c0_i32_1 = arith.constant 0 : i32
    return %c0_i32, %c0_i32_0 : i32, i32
  }
  func.func @transform_8(%arg0: i32) -> (i32, i32) {
    %c0_i32 = arith.constant 0 : i32
    %c0_i32_0 = arith.constant 0 : i32
    %c0_i32_1 = arith.constant 0 : i32
    return %c0_i32, %c0_i32_0 : i32, i32
  }
  func.func @transform_9(%arg0: i32) -> (i32, i32) {
    %c0_i32 = arith.constant 0 : i32
    %c0_i32_0 = arith.constant 0 : i32
    return %arg0, %c0_i32 : i32, i32
  }
}

</mosaic_0001>

<bundles_post_ra>
// kernel: ffnet_forward.1
= control target key start
LH: loop header
LB: loop body
LE: loop exit
PB: predicated region body
PF: predicated region fallthrough
CT: control target
= control target key end

     0   :  { %s688_s0 = inlined_call_operand.vmem [shape: f32[16,16], index: 0, kind: input, shape index: {}]   ;;  %s689_s1 = inlined_call_operand.vmem [shape: f32[36,16], index: 1, kind: input, shape index: {}]   ;;  %s690_s2 = inlined_call_operand.vmem [shape: f32[36,1], index: 2, kind: input, shape index: {}]   ;;  %s691_s3 = inlined_call_operand.vmem [shape: f32[12,36], index: 3, kind: input, shape index: {}]   ;;  %s692_s4 = inlined_call_operand.vmem [shape: f32[12,1], index: 4, kind: input, shape index: {}]   ;;  %s693_s5 = inlined_call_operand.vmem [shape: f32[6,12], index: 5, kind: input, shape index: {}]   ;;  %s694_s6 = inlined_call_operand.vmem [shape: f32[6,1], index: 6, kind: input, shape index: {}]   ;;  %s695_s7 = inlined_call_operand.vmem [shape: f32[6,1], index: 7, kind: input, shape index: {}]   ;;  %s696_s8 = inlined_call_operand.<no memory space> [shape: f32[1,1], index: 8, kind: input, shape index: {}]   ;;  %s697_s9 = inlined_call_operand.hbm [shape: f32[1,16], index: 9, kind: output, shape index: {}]  }
   0x1   :  { %v14_v0 = vstv %s696_s8 }
   0x2   :  { %15 = vst [vmem:[#allocation2] sm:$0x1] %v14_v0 }
   0x3   :  { %v53_v1 = vld [vmem:[%s688_s0] sm:$0xff]  ;;  %v54_v2 = vld [vmem:[%s688_s0 + $0x8] sm:$0xff]  ;;  %vm80_vm0 = vcmask 130048   ;;  %v534_v3 = vmov 0.0|0.0   ;;  %vm535_vm2 = vmmov 0   ;;  %v536_v5 = vmov 0.0  }
   0x4   :  { %486 = vmatprep.subr.bf16.mxu0 %v534_v3  ;;  %v487_v4 = vpack.c.bf16 %v54_v2, %v53_v1  ;;  %vm488_vm1 = vmpackc.low %vm80_vm0, %vm80_vm0  ;;  %451 = vmatprep.mubr.msk.f32.mxu0 %vm535_vm2, %v536_v5  ;;  %v537_v6 = vmov 0   ;;  %v44_v7 = vld [vmem:[%s690_s2] sm:$0xff]  ;;  %v46_v8 = vld [vmem:[%s690_s2 + $0x10] sm:$0xff] }
   0x5   :  { %508 = vset.pattern.permute.xlu0 %v537_v6  ;;  %509 = vset.pattern.permute.xlu1 %v537_v6  ;;  %v45_v9 = vld [vmem:[%s690_s2 + $0x8] sm:$0xff]  ;;  %v47_v10 = vld [vmem:[%s690_s2 + $0x18] sm:$0xff] }
   0x6   :  { %489 = vmatpush3.bf16.xpose.msk.msra.mxu0 %vm488_vm1, %v487_v4  ;;  %57 = vperm.xlu0 %508, %v44_v7  }
   0x7   :  { %67 = vperm.xlu1 %509, %v46_v8  }
   0x8   :  { %16 = vsyncpa [#allocation4], 0  ;;  %v35_v11 = vld [vmem:[%s689_s1] sm:$0xff]  ;;  %v36_v14 = vld [vmem:[%s689_s1 + $0x8] sm:$0xff]  ;;  %vm207_vm3 = vcmask 293888   ;;  %vm214_vm4 = vcmask 1043456   ;;  %v397_v4 = vlaneseq }
   0x9   :  { %v48_v12 = vld [vmem:[%s690_s2 + $0x20] sm:$0xf]  ;;  %v50_v15 = vld [vmem:[%s692_s4 + $0x8] sm:$0xf]  ;;  %v37_v17 = vld [vmem:[%s689_s1 + $0x10] sm:$0xff]  ;;  %vm538_vm5 = vmmov 1  }
   0xa   :  { %62 = vperm.xlu0 %508, %v45_v9   ;;  %v49_v13 = vld [vmem:[%s692_s4] sm:$0xff]  ;;  %v38_v20 = vld [vmem:[%s689_s1 + $0x18] sm:$0xff]  ;;  %v41_v50 = vld [vmem:[%s691_s3 + $0x8] sm:$0xf]  ;;  %vm300_vm7 = vcmask 97280   ;;  %vm384_vm8 = vcmask 128000  }
   0xb   :  { %72 = vperm.xlu1 %509, %v47_v10   ;;  %v51_v16 = vld [vmem:[%s694_s6] sm:$0x3f]  ;;  %vm500_vm6 = vmpackc.low %vm214_vm4, %vm538_vm5  ;;  %v398_v7 = vshrl.u32 %v397_v4, 7  ;;  %vm402_vm9 = vcmask 122880  }
   0xc   :  { %v43_v18 = vld [vmem:[%s695_s7] sm:$0x3f] }
   0xd   :  { %452 = vmatmul.mubr.msk.f32.vlgmr.msra.gmra.mrb[0].mxu0 %vm80_vm0, %v35_v11  ;;  %v52_v19 = vld [vmem:[#allocation2] sm:$0x1]  ;;  %v399_v10 = vsub.s32 0, %v398_v7 }
   0xe   :  { %454 = vmatprep.mubr.msk.f32.mxu0 %vm535_vm2, %v536_v5  ;;  %77 = vperm.xlu0 %508, %v48_v12   ;;  %v39_v21 = vld [vmem:[%s689_s1 + $0x20] sm:$0xf] }
   0xf   :  { %199 = vperm.xlu1 %509, %v49_v13   ;;  %v40_v22 = vld [vmem:[%s691_s3] sm:$0xff] }
  0x10   :  { %476 = vmatprep.mubr.msk.f32.mxu1 %vm207_vm3, %v40_v22  ;;  %v42_v60 = vld [vmem:[%s693_s5] sm:$0x3f]  ;;  %s539_s5 = smov [#allocation3]  }
  0x11   :  { %455 = vmatmul.mubr.msk.f32.gmra.mrb[2].mxu0 %vm80_vm0, %v36_v14  ;;  %s410_s18 = sshll.u32 %s539_s5, 4  ;;  %s411_s18 = int_to_ptr.vmem [resolvable:$true] %s410_s18 }
  0x12   :  { %457 = vmatprep.mubr.msk.f32.mxu0 %vm535_vm2, %v536_v5  ;;  %204 = vperm.xlu0 %508, %v50_v15   ;;  %s510_s19 = scalar_lea.vmem %s411_s18, 16  ;;  %s514_s20 = scalar_lea.vmem %s411_s18, 32 }
  0x13   :  { %297 = vperm.xlu1 %509, %v51_v16   ;;  %p511_p0 = scmp.ne.s32.totalorder %s411_s18, %s510_s19  ;;  %p515_p1 = scmp.lt.s32.totalorder %s411_s18, %s411_s18 }
  0x14   :  { %p516_p2 = scmp.lt.s32.totalorder %s514_s20, %s510_s19 }
  0x15   :  { %458 = vmatmul.mubr.msk.f32.gmra.mrb[4].mxu0 %vm80_vm0, %v37_v17 }
  0x16   :  { %460 = vmatprep.mubr.msk.f32.mxu0 %vm535_vm2, %v536_v5  ;;  %380 = vperm.xlu0 %508, %v43_v18   ;;  %p517_p3 = por %p516_p2, %p515_p1 }
  0x17   :  { %394 = vperm.xlu1 %509, %v52_v19  }
  0x18   :  { %p518_p4 = pnand %p517_p3, %p511_p0 }
  0x19   :  { %461 = vmatmul.mubr.msk.f32.gmra.mrb[6].mxu0 %vm80_vm0, %v38_v20 }
  0x1a   :  { %463 = vmatprep.mubr.msk.f32.mxu0 %vm535_vm2, %v536_v5 }
  0x1d   :  { %464 = vmatmul.mubr.msk.f32.gmra.mrb[8].mxu0 %vm80_vm0, %v39_v21 }
  0x85   :  { %v58_v23 = vpop.permute.xlu0 %57 }
  0x86   :  { %v68_v31 = vpop.permute.xlu1 %67 }
  0x89   :  { %v63_v27 = vpop.permute.xlu0 %62 }
  0x8a   :  { %v73_v38 = vpop.permute.xlu1 %72 }
  0x8d   :  { %v78_v44 = vpop.permute.xlu0 %77 }
  0x8e   :  { %v200_v53 = vpop.permute.xlu1 %199 }
  0x91   :  { %v205_v51 = vpop.permute.xlu0 %204 }
  0x92   :  { %v298_v61 = vpop.permute.xlu1 %297 }
  0x95   :  { %v381_v2 = vpop.permute.xlu0 %380 }
  0x96   :  { %v395_v12 = vpop.permute.xlu1 %394 }
  0x97   :  { %v400_v14 = vrot.slane %v395_v12, %v399_v10 }
  0xe0   :  { %v168_v24 = vpop.f32.mrb[0].mxu0 }
  0xe1   :  { %v453_v25 = vpop.f32.mrb[1].mxu0  ;;  %v169_v26 = vadd.f32 %v168_v24, %v58_v23 }
  0xe3   :  { %v192_v32 = vmax.f32 %v169_v26, 0.0 }
  0xe4   :  { %v173_v28 = vpop.f32.mrb[2].mxu0 }
  0xe5   :  { %v174_v29 = vadd.f32 %v173_v28, %v63_v27  ;;  %v456_v30 = vpop.f32.mrb[3].mxu0 }
  0xe7   :  { %v193_v33 = vmax.f32 %v174_v29, 0.0 }
  0xe8   :  { %v178_v34 = vpop.f32.mrb[4].mxu0 }
  0xe9   :  { %v459_v35 = vpop.f32.mrb[5].mxu0  ;;  %v490_v36 = vpack.c.bf16 %v193_v33, %v192_v32  ;;  %v179_v37 = vadd.f32 %v178_v34, %v68_v31 }
  0xeb   :  { %491 = vmatprep.subr.bf16.mxu1 %v490_v36  ;;  %v194_v42 = vmax.f32 %v179_v37, 0.0 }
  0xec   :  { %v183_v39 = vpop.f32.mrb[6].mxu0  ;;  %493 = vmatpush3.bf16.msra.mxu1 %v490_v36 }
  0xed   :  { %v184_v40 = vadd.f32 %v183_v39, %v73_v38  ;;  %v462_v41 = vpop.f32.mrb[7].mxu0 }
  0xef   :  { %v195_v43 = vmax.f32 %v184_v40, 0.0 }
  0xf0   :  { %v188_v45 = vpop.f32.mrb[8].mxu0 }
  0xf1   :  { %v494_v46 = vpack.c.bf16 %v195_v43, %v194_v42  ;;  %v189_v47 = vadd.f32 %v188_v45, %v78_v44  ;;  %v465_v48 = vpop.f32.mrb[9].mxu0 }
  0xf3   :  { %v196_v49 = vmax.f32 %v189_v47, 0.0  ;;  %495 = vmatprep.subr.bf16.mxu1 %v494_v46 }
  0xf4   :  { %497 = vmatpush3.bf16.msra.mxu1 %v494_v46 }
  0xf5   :  { %474 = vmatprep.subr.msk.mxu1 %vm214_vm4, %v196_v49 }
  0xf8   :  { %475 = vmatpush3.msk.msra.mxu1 %vm214_vm4, %v196_v49 }
  0xf9   :  { %477 = vmatmul.mubr.msk.f32.vlgmr.msra.gmra.mrb[0].mxu1 %vm207_vm3, %v41_v50  ;;  %498 = vmatprep.subr.bf16.mxu1 %v534_v3 }
  0xfa   :  { %483 = vmatprep.mubr.msk.f32.mxu1 %vm535_vm2, %v536_v5 }
 0x1cc   :  { %v478_v52 = vpop.f32.mrb[0].mxu1 }
 0x1cd   :  { %v290_v54 = vadd.f32 %v478_v52, %v205_v51  ;;  %v284_v55 = vpop.f32.mrb[1].mxu1 }
 0x1ce   :  { %v285_v56 = vadd.f32 %v284_v55, %v200_v53 }
 0x1cf   :  { %v294_v57 = vmax.f32 %v290_v54, 0.0 }
 0x1d0   :  { %v293_v58 = vmax.f32 %v285_v56, 0.0 }
 0x1d2   :  { %v499_v59 = vpack.c.bf16 %v294_v57, %v293_v58 }
 0x1d4   :  { %501 = vmatpush3.bf16.msk.msra.mxu1 %vm500_vm6, %v499_v59 }
 0x1d7   :  { %484 = vmatmul.mubr.msk.f32.vlgmr.msra.gmra.mrb[2].mxu1 %vm300_vm7, %v42_v60 }
 0x2aa   :  { %v373_v62 = vpop.f32.mrb[2].mxu1 }
 0x2ab   :  { %v374_v63 = vadd.f32 %v373_v62, %v298_v61  ;;  %v485_v0 = vpop.f32.mrb[3].mxu1 }
 0x2ad   :  { %v377_v1 = vmax.f32 %v374_v63, 0.0 }
 0x2af   :  { %v383_v3 = vmul.f32 %v381_v2, %v377_v1 }
 0x2b1   :  { %v385_v5 = vsel %vm384_vm8, %v383_v3, 0.0 }
 0x2b2   :  { %v386_v6 = vrot.slane %v385_v5, 4 }
 0x2b4   :  { %v387_v8 = vadd.f32 %v386_v6, %v385_v5 }
 0x2b6   :  { %v388_v9 = vrot.slane %v387_v8, 2 }
 0x2b8   :  { %v389_v11 = vadd.f32 %v388_v9, %v387_v8 }
 0x2ba   :  { %v390_v13 = vrot.slane %v389_v11, 1 }
 0x2bc   :  { %v391_v15 = vadd.f32 %v390_v13, %v389_v11 }
 0x2be   :  { %v401_v16 = vadd.f32 %v400_v14, %v391_v15 }
 0x2c0   :  { %403 = vst.msk [vmem:[#allocation3] sm:$0x1] %vm402_vm9, %v401_v16 }
 0x2c1   :  { %521 = shalt.err (!%p518_p4)
}
 0x2c2   :  { %s522_s23 = scalar_lea.hbm %s697_s9, 16 }
 0x2c3   :  { %p523_p5 = scmp.ne.s32.totalorder %s697_s9, %s522_s23  ;;  %p526_p6 = scmp.lt.u32.totalorder %s522_s23, %s697_s9 }
 0x2c5   :  { %p528_p7 = pnand %p526_p6, %p523_p5 }
 0x2c7   :  { %531 = shalt.err (!%p528_p7)
}
 0x2c8   :  { %413 = dma.vmem_to_hbm [thread:$0]  %s411_s18, 16, %s697_s9, [#allocation4]  }
 0x2c9   :  { %532 = dma.done.wait [#allocation4], 16  }
 0x2ca   :  { %533 = vsyncadd [#allocation4], 4294967280 }
 0x2cb   :  { %417 = vsyncpa [#allocation4], 1 }

</bundles_post_ra>
